<compile_context>
chip_gen: v5e
topology: v5e:2x2
jax: 0.10.0
libtpu: 0.0.40
codegen_flags: <defaults>
</compile_context>

<pallas_src>
import functools

import jax
import jax.numpy as jnp
from jax.experimental import pallas as pl
from jax.experimental.pallas import tpu as pltpu


def _round_up(a, b):
    return ((a + b - 1) // b) * b


def _round_down(a, b):
    return (a // b) * b


@functools.lru_cache(maxsize=None)
def _vmem_budget_bytes():
    """Per-TensorCore VMEM budget with headroom (generation-aware)."""
    cap = 64 << 20  # conservative default = v7x per-TC VMEM
    try:
        info = pltpu.get_tpu_info()
        cap = int(getattr(info, "vmem_capacity_bytes", cap))
    except Exception:
        pass
    cap = min(cap, 128 << 20)
    headroom = max(8 << 20, cap // 8)   # compiler-internal scratch, semaphores, ...
    return cap - headroom               # v7x: ~56 MiB, v5e/v6e: ~112 MiB


# ----------------------------------------------------------------------------
# Fused kernel: per (row-tile i, out-feature-tile j) grid step
#   j == 0 : LayerNorm the row tile in f32, store once (in matmul dtype) to a
#            VMEM scratch that stays resident across j.
#   all j  : MXU matmul scratch @ W^T tile (+ bias), write 128-aligned output.
# ----------------------------------------------------------------------------
def _prenorm_linear_kernel(x_ref, gamma_ref, beta_ref, wt_ref, b_ref, o_ref,
                           normed_ref, *, eps):
    j = pl.program_id(1)

    @pl.when(j == 0)
    def _():
        x = x_ref[...].astype(jnp.float32)                     # (TR, D)
        mean = jnp.mean(x, axis=-1, keepdims=True)
        centered = x - mean
        var = jnp.mean(centered * centered, axis=-1, keepdims=True)
        inv = jax.lax.rsqrt(var + eps)
        y = centered * inv
        y = y * gamma_ref[...].astype(jnp.float32) + beta_ref[...].astype(jnp.float32)
        normed_ref[...] = y.astype(normed_ref.dtype)           # cast ONCE, stays in VMEM

    acc = jnp.dot(normed_ref[...], wt_ref[...],
                  preferred_element_type=jnp.float32)           # (TR, TN) f32
    acc = acc + b_ref[...].astype(jnp.float32)
    o_ref[...] = acc.astype(o_ref.dtype)


def _choose_fused_tiles(rows, d, n_p, x_bytes, w_bytes, o_bytes):
    """Pick (tile_rows, tile_n) so double-buffered tiles + scratch fit VMEM."""
    usable = _vmem_budget_bytes() - (4 << 20)   # margin for gamma/beta/bias/etc.
    scratch_bytes = w_bytes                     # scratch stored in matmul dtype

    # Output-feature tile (multiple of 128). Keep whole W^T resident if cheap:
    # a constant block index means Pallas fetches it only once.
    if 2 * d * n_p * w_bytes <= usable // 2:
        tile_n = n_p
    elif n_p % 256 == 0:
        tile_n = 256
    else:
        tile_n = 128

    # Row tile: fill the remaining budget, cap at 512 rows, multiple of 8.
    left = usable - 2 * d * tile_n * w_bytes
    per_row = d * (2 * x_bytes + scratch_bytes) + 2 * tile_n * o_bytes
    tr = max(8, _round_down(max(left, 0) // max(per_row, 1), 8))
    tile_rows = min(512, tr, _round_up(rows, 8))

    # Balance tiles (no tiny ragged tail) and keep >=2 row tiles when possible
    # so both TensorCores (v7x megacore) get work on the "parallel" axis.
    n_row_tiles = pl.cdiv(rows, tile_rows)
    if n_row_tiles == 1 and rows > 8:
        n_row_tiles = 2
    tile_rows = min(tile_rows, _round_up(pl.cdiv(rows, n_row_tiles), 8))
    return tile_rows, tile_n


def prenorm_linear_pallas(x2d, gamma, beta, wt_p, bias_p, *, eps=1e-5):
    """Fused LayerNorm(d) -> Linear(d, n_p) on a (rows, d) input.

    wt_p is the PRE-TRANSPOSED, 128-padded weight of shape (d, n_p);
    bias_p has shape (n_p,). Padding/transpose happen once at setup."""
    rows, d = x2d.shape
    d_w, n_p = wt_p.shape
    assert d_w == d, "weight inner dim must match feature dim"
    assert n_p % 128 == 0, "padded output dim must be lane-aligned"

    x_bytes = jnp.dtype(x2d.dtype).itemsize
    w_bytes = jnp.dtype(wt_p.dtype).itemsize
    tile_rows, tile_n = _choose_fused_tiles(rows, d, n_p, x_bytes, w_bytes, x_bytes)

    grid = (pl.cdiv(rows, tile_rows), n_p // tile_n)   # ragged rows handled by Pallas

    gamma2d = gamma.reshape(1, d)
    beta2d = beta.reshape(1, d)
    b2d = bias_p.reshape(1, n_p)

    return pl.pallas_call(
        functools.partial(_prenorm_linear_kernel, eps=eps),
        out_shape=jax.ShapeDtypeStruct((rows, n_p), x2d.dtype),
        grid_spec=pltpu.PrefetchScalarGridSpec(
            num_scalar_prefetch=0,
            grid=grid,
            in_specs=[
                pl.BlockSpec((tile_rows, d), lambda i, j: (i, 0)),   # x row tile
                pl.BlockSpec((1, d), lambda i, j: (0, 0)),           # gamma (resident)
                pl.BlockSpec((1, d), lambda i, j: (0, 0)),           # beta  (resident)
                pl.BlockSpec((d, tile_n), lambda i, j: (0, j)),      # W^T tile
                pl.BlockSpec((1, tile_n), lambda i, j: (0, j)),      # bias tile
            ],
            out_specs=pl.BlockSpec((tile_rows, tile_n), lambda i, j: (i, j)),
            scratch_shapes=[pltpu.VMEM((tile_rows, d), wt_p.dtype)],
        ),
        compiler_params=pltpu.CompilerParams(
            dimension_semantics=("parallel", "arbitrary"),
            vmem_limit_bytes=int(_vmem_budget_bytes()),
        ),
    )(x2d, gamma2d, beta2d, wt_p, b2d)


# ----------------------------------------------------------------------------
# Standalone LayerNorm kernel (generic PreNorm path when fn is arbitrary).
# ----------------------------------------------------------------------------
def _layernorm_kernel(x_ref, gamma_ref, beta_ref, o_ref, *, eps):
    x = x_ref[...].astype(jnp.float32)
    mean = jnp.mean(x, axis=-1, keepdims=True)
    centered = x - mean
    var = jnp.mean(centered * centered, axis=-1, keepdims=True)
    inv = jax.lax.rsqrt(var + eps)
    y = centered * inv
    o_ref[...] = (y * gamma_ref[...].astype(jnp.float32)
                  + beta_ref[...].astype(jnp.float32)).astype(o_ref.dtype)


def layernorm_pallas(x2d, gamma, beta, *, eps=1e-5):
    rows, d = x2d.shape
    x_bytes = jnp.dtype(x2d.dtype).itemsize
    budget = _vmem_budget_bytes()

    # ~12 MiB per x block (already ~roofline), and double-buffered in+out must
    # fit the generation-specific budget (critical on v7x's 64 MiB).
    per_row = d * x_bytes
    tile_rows = min((12 << 20) // per_row, (budget - (2 << 20)) // (4 * per_row))
    tile_rows = max(8, _round_down(tile_rows, 8))
    tile_rows = min(tile_rows, 1024, _round_up(rows, 8))

    n_tiles = pl.cdiv(rows, tile_rows)
    if n_tiles == 1 and rows > 8:
        n_tiles = 2                              # feed both TCs on v7x
    tile_rows = min(tile_rows, _round_up(pl.cdiv(rows, n_tiles), 8))

    gamma2d = gamma.reshape(1, d)
    beta2d = beta.reshape(1, d)

    return pl.pallas_call(
        functools.partial(_layernorm_kernel, eps=eps),
        out_shape=jax.ShapeDtypeStruct((rows, d), x2d.dtype),
        grid_spec=pltpu.PrefetchScalarGridSpec(
            num_scalar_prefetch=0,
            grid=(pl.cdiv(rows, tile_rows),),    # ragged last block handled by Pallas
            in_specs=[
                pl.BlockSpec((tile_rows, d), lambda i: (i, 0)),
                pl.BlockSpec((1, d), lambda i: (0, 0)),
                pl.BlockSpec((1, d), lambda i: (0, 0)),
            ],
            out_specs=pl.BlockSpec((tile_rows, d), lambda i: (i, 0)),
        ),
        compiler_params=pltpu.CompilerParams(
            dimension_semantics=("parallel",),
            vmem_limit_bytes=int(_vmem_budget_bytes()),
        ),
    )(x2d, gamma2d, beta2d)


# ----------------------------------------------------------------------------
# PreNorm front-ends.
# ----------------------------------------------------------------------------
def pre_norm(x, gamma, beta, fn, **kwargs):
    """Generic PreNorm: fn(LayerNorm(x), **kwargs); LN runs as a Pallas kernel."""
    b, s, d = x.shape
    normed = layernorm_pallas(x.reshape(b * s, d), gamma, beta).reshape(b, s, d)
    return fn(normed, **kwargs)


def make_prenorm_linear(gamma, beta, weight, bias, eps=1e-5):
    """PreNorm with fn = Linear(dim_in, dim_out): one fully fused Pallas kernel.

    The PyTorch-convention weight (dim_out, dim_in) is transposed and padded to
    a 128-aligned output dim ONCE here, outside the per-forward hot path."""
    weight = jnp.asarray(weight)
    bias = jnp.asarray(bias)
    gamma = jnp.asarray(gamma)
    beta = jnp.asarray(beta)

    dim_out, dim_in = weight.shape
    n_p = _round_up(dim_out, 128)                # lane-dense output tiles
    wt_p = weight.T                              # (dim_in, dim_out)
    bias_p = bias
    if n_p != dim_out:
        wt_p = jnp.pad(wt_p, ((0, 0), (0, n_p - dim_out)))
        bias_p = jnp.pad(bias, (0, n_p - dim_out))

    def forward(x, **kwargs):
        del kwargs  # deterministic Linear fn takes no extra kwargs
        b, s, d = x.shape
        y = prenorm_linear_pallas(x.reshape(b * s, d), gamma, beta, wt_p, bias_p,
                                  eps=eps)
        if n_p != dim_out:
            y = y[:, :dim_out]
        return y.reshape(b, s, dim_out)

    return forward


# ----------------------------------------------------------------------------
# Pure-JAX reference for correctness check.
# ----------------------------------------------------------------------------
def pre_norm_ref(x, gamma, beta, weight, bias, eps=1e-5):
    xf = x.astype(jnp.float32)
    mean = jnp.mean(xf, axis=-1, keepdims=True)
    var = jnp.mean((xf - mean) ** 2, axis=-1, keepdims=True)
    y = (xf - mean) * jax.lax.rsqrt(var + eps) * gamma + beta
    return jnp.dot(y, weight.T) + bias


if __name__ == "__main__":
    key = jax.random.PRNGKey(0)
    batch, seq, dim = 2, 8, 32

    k_x, k_g, k_b, k_w, k_bias, k_x2 = jax.random.split(key, 6)
    x = jax.random.normal(k_x, (batch, seq, dim), dtype=jnp.float32)

    # LayerNorm params (perturbed so the affine path is exercised).
    gamma = jnp.ones((dim,), jnp.float32) + 0.1 * jax.random.normal(k_g, (dim,))
    beta = 0.1 * jax.random.normal(k_b, (dim,))

    # fn = Linear(dim, dim), deterministic init (PyTorch weight convention).
    weight = jax.random.normal(k_w, (dim, dim), dtype=jnp.float32) * 0.05
    bias = 0.01 * jax.random.normal(k_bias, (dim,))

    # --- Fused PreNorm(LayerNorm, Linear) path ---
    prenorm_linear = make_prenorm_linear(gamma, beta, weight, bias)
    out = jax.block_until_ready(prenorm_linear(x))
    ref = pre_norm_ref(x, gamma, beta, weight, bias)
    assert out.shape == (batch, seq, dim)
    assert jnp.allclose(out, ref, atol=1e-4, rtol=1e-4), "fused kernel mismatch"

    # --- Generic PreNorm path (arbitrary fn), also exercises ragged row blocks ---
    x_odd = jax.random.normal(k_x2, (3, 5, dim), dtype=jnp.float32)  # 15 rows, not /8
    fn = lambda z: jnp.dot(z, weight.T) + bias
    out_g = jax.block_until_ready(pre_norm(x_odd, gamma, beta, fn))
    ref_g = pre_norm_ref(x_odd, gamma, beta, weight, bias)
    assert out_g.shape == (3, 5, dim)
    assert jnp.allclose(out_g, ref_g, atol=1e-4, rtol=1e-4), "generic path mismatch"

    print("KERNEL_OK")
</pallas_src>

<mosaic_0001>
module attributes {stable_mosaic.version = 11 : i64} {
  func.func @_prenorm_linear_kernel(%arg0: i32, %arg1: i32, %arg2: memref<8x32xf32, #tpu.memory_space<vmem>>, %arg3: memref<1x32xf32, #tpu.memory_space<vmem>>, %arg4: memref<1x32xf32, #tpu.memory_space<vmem>>, %arg5: memref<32x128xf32, #tpu.memory_space<vmem>>, %arg6: memref<1x128xf32, #tpu.memory_space<vmem>>, %arg7: memref<8x128xf32, #tpu.memory_space<vmem>>, %arg8: memref<8x32xf32, #tpu.memory_space<vmem>>) attributes {dimension_semantics = [#tpu.dimension_semantics<parallel>, #tpu.dimension_semantics<arbitrary>], iteration_bounds = array<i64: 2, 1>, scalar_prefetch = 0 : i64, scratch_operands = 1 : i64, tpu.core_type = #tpu.core_type<tc>, window_params = [{transform_indices = @transform_0, window_bounds = array<i64: 8, 32>}, {pipeline_mode = #tpu.pipeline_mode<synchronous>, transform_indices = @transform_1, window_bounds = array<i64: 1, 32>}, {pipeline_mode = #tpu.pipeline_mode<synchronous>, transform_indices = @transform_2, window_bounds = array<i64: 1, 32>}, {transform_indices = @transform_3, window_bounds = array<i64: 32, 128>}, {transform_indices = @transform_4, window_bounds = array<i64: 1, 128>}, {transform_indices = @transform_5, window_bounds = array<i64: 8, 128>}]} {
    %c0_i32 = arith.constant 0 : i32
    %0 = arith.cmpi eq, %arg1, %c0_i32 : i32
    %1 = arith.extui %0 : i1 to i32
    %c0_i32_0 = arith.constant 0 : i32
    %2 = arith.cmpi ne, %1, %c0_i32_0 : i32
    scf.if %2 {
      %c0_8 = arith.constant 0 : index
      %c0_9 = arith.constant 0 : index
      %10 = vector.load %arg2[%c0_8, %c0_9] : memref<8x32xf32, #tpu.memory_space<vmem>>, vector<8x32xf32>
      %cst_10 = arith.constant dense<0.000000e+00> : vector<8xf32>
      %11 = vector.multi_reduction <add>, %10, %cst_10 [1] : vector<8x32xf32> to vector<8xf32>
      %12 = vector.shape_cast %11 : vector<8xf32> to vector<8x1xf32>
      %cst_11 = arith.constant 3.200000e+01 : f32
      %13 = vector.broadcast %cst_11 : f32 to vector<8x1xf32>
      %14 = arith.divf %12, %13 : vector<8x1xf32>
      %15 = vector.broadcast %14 : vector<8x1xf32> to vector<8x32xf32>
      %16 = arith.subf %10, %15 : vector<8x32xf32>
      %17 = arith.mulf %16, %16 : vector<8x32xf32>
      %cst_12 = arith.constant dense<0.000000e+00> : vector<8xf32>
      %18 = vector.multi_reduction <add>, %17, %cst_12 [1] : vector<8x32xf32> to vector<8xf32>
      %19 = vector.shape_cast %18 : vector<8xf32> to vector<8x1xf32>
      %cst_13 = arith.constant 3.200000e+01 : f32
      %20 = vector.broadcast %cst_13 : f32 to vector<8x1xf32>
      %21 = arith.divf %19, %20 : vector<8x1xf32>
      %cst_14 = arith.constant 9.99999974E-6 : f32
      %22 = vector.broadcast %cst_14 : f32 to vector<8x1xf32>
      %23 = arith.addf %21, %22 : vector<8x1xf32>
      %24 = math.rsqrt %23 : vector<8x1xf32>
      %25 = vector.broadcast %24 : vector<8x1xf32> to vector<8x32xf32>
      %26 = arith.mulf %16, %25 : vector<8x32xf32>
      %c0_15 = arith.constant 0 : index
      %c0_16 = arith.constant 0 : index
      %27 = vector.load %arg3[%c0_15, %c0_16] : memref<1x32xf32, #tpu.memory_space<vmem>>, vector<1x32xf32>
      %28 = vector.broadcast %27 : vector<1x32xf32> to vector<8x32xf32>
      %29 = arith.mulf %26, %28 : vector<8x32xf32>
      %c0_17 = arith.constant 0 : index
      %c0_18 = arith.constant 0 : index
      %30 = vector.load %arg4[%c0_17, %c0_18] : memref<1x32xf32, #tpu.memory_space<vmem>>, vector<1x32xf32>
      %31 = vector.broadcast %30 : vector<1x32xf32> to vector<8x32xf32>
      %32 = arith.addf %29, %31 : vector<8x32xf32>
      %c0_19 = arith.constant 0 : index
      %c0_20 = arith.constant 0 : index
      %33 = vector.load %arg8[%c0_19, %c0_20] : memref<8x32xf32, #tpu.memory_space<vmem>>, vector<8x32xf32>
      tpu.vector_store %arg8[%c0_19, %c0_20], %32 {strides = array<i32>} : memref<8x32xf32, #tpu.memory_space<vmem>>, vector<8x32xf32>,
    } else {
    }
    %c0 = arith.constant 0 : index
    %c0_1 = arith.constant 0 : index
    %3 = vector.load %arg8[%c0, %c0_1] : memref<8x32xf32, #tpu.memory_space<vmem>>, vector<8x32xf32>
    %c0_2 = arith.constant 0 : index
    %c0_3 = arith.constant 0 : index
    %4 = vector.load %arg5[%c0_2, %c0_3] : memref<32x128xf32, #tpu.memory_space<vmem>>, vector<32x128xf32>
    %cst = arith.constant dense<0.000000e+00> : vector<8x128xf32>
    %5 = tpu.matmul %3, %4, %cst {dimension_numbers = #tpu.dot_dimension_numbers<[1], [0], [0], [1], [0, 0, 1, 1], [], []>} : vector<8x32xf32>, vector<32x128xf32>, vector<8x128xf32> -> vector<8x128xf32>
    %c0_4 = arith.constant 0 : index
    %c0_5 = arith.constant 0 : index
    %6 = vector.load %arg6[%c0_4, %c0_5] : memref<1x128xf32, #tpu.memory_space<vmem>>, vector<1x128xf32>
    %7 = vector.broadcast %6 : vector<1x128xf32> to vector<8x128xf32>
    %8 = arith.addf %5, %7 : vector<8x128xf32>
    %c0_6 = arith.constant 0 : index
    %c0_7 = arith.constant 0 : index
    %9 = vector.load %arg7[%c0_6, %c0_7] : memref<8x128xf32, #tpu.memory_space<vmem>>, vector<8x128xf32>
    tpu.vector_store %arg7[%c0_6, %c0_7], %8 {strides = array<i32>} : memref<8x128xf32, #tpu.memory_space<vmem>>, vector<8x128xf32>,
    return
  }
  func.func @transform_0(%arg0: i32, %arg1: i32) -> (i32, i32) {
    %c0_i32 = arith.constant 0 : i32
    %c0_i32_0 = arith.constant 0 : i32
    return %arg0, %c0_i32 : i32, i32
  }
  func.func @transform_1(%arg0: i32, %arg1: i32) -> (i32, i32) {
    %c0_i32 = arith.constant 0 : i32
    %c0_i32_0 = arith.constant 0 : i32
    %c0_i32_1 = arith.constant 0 : i32
    return %c0_i32, %c0_i32_0 : i32, i32
  }
  func.func @transform_2(%arg0: i32, %arg1: i32) -> (i32, i32) {
    %c0_i32 = arith.constant 0 : i32
    %c0_i32_0 = arith.constant 0 : i32
    %c0_i32_1 = arith.constant 0 : i32
    return %c0_i32, %c0_i32_0 : i32, i32
  }
  func.func @transform_3(%arg0: i32, %arg1: i32) -> (i32, i32) {
    %c0_i32 = arith.constant 0 : i32
    %c0_i32_0 = arith.constant 0 : i32
    return %c0_i32, %arg1 : i32, i32
  }
  func.func @transform_4(%arg0: i32, %arg1: i32) -> (i32, i32) {
    %c0_i32 = arith.constant 0 : i32
    %c0_i32_0 = arith.constant 0 : i32
    return %c0_i32, %arg1 : i32, i32
  }
  func.func @transform_5(%arg0: i32, %arg1: i32) -> (i32, i32) {
    %c0_i32 = arith.constant 0 : i32
    return %arg0, %arg1 : i32, i32
  }
}

</mosaic_0001>

<bundles_post_ra>
// kernel: tpu_custom_call.1
= control target key start
LH: loop header
LB: loop body
LE: loop exit
PB: predicated region body
PF: predicated region fallthrough
CT: control target
= control target key end

     0   :  { %10 = vsyncpa [#allocation4], 0  ;;  %s1002_s0 = inlined_call_operand.hbm [shape: f32[16,32], index: 0, kind: input, shape index: {}]   ;;  %s1003_s1 = inlined_call_operand.hbm [shape: f32[1,32], index: 1, kind: input, shape index: {}]   ;;  %s1004_s2 = inlined_call_operand.vmem [shape: f32[1,32], index: 2, kind: input, shape index: {}]   ;;  %s1005_s3 = inlined_call_operand.hbm [shape: f32[32,128], index: 3, kind: input, shape index: {}]   ;;  %s1006_s4 = inlined_call_operand.vmem [shape: f32[1,128], index: 4, kind: input, shape index: {}]   ;;  %s1007_s5 = inlined_call_operand.hbm [shape: f32[16,128], index: 5, kind: output, shape index: {}]  }
   0x1   :  { %12 = vsyncpa [#allocation4 + $0x1], 0 }
   0x2   :  { %13 = vsyncpa [#allocation7], 0 }
   0x3   :  { %14 = vsyncpa [#allocation5], 0 }
   0x4   :  { %16 = vsyncpa [#allocation5 + $0x1], 0  ;;  %s842_s18 = smov 0   ;;  %s844_s19 = smov 0  }
   0x5   :  { %s846_s20 = smov 0   ;;  %s848_s21 = smov 0  }
   0x6   :  { %s850_s22 = smov 0   ;;  %s852_s23 = smov 0  }
   0x7 LB: > { %s517_s24 = sadd.s32 4294967295, %s805_s23   ;;  %s518_s25 = sadd.s32 4294967294, %s805_s23   ;;  %s805_s23 = sphi %s852_s23, %s22_s23   ;;  %s801_s22 = sphi %s850_s22, %s1017_s22   ;;  %s797_s21 = sphi %s848_s21, %s1016_s21   ;;  %s793_s20 = sphi %s846_s20, %s1015_s20   ;;  %s789_s19 = sphi %s844_s19, %s1014_s19   ;;  %s785_s18 = sphi %s842_s18, %s1013_s18  }
   0x8   : > { %p54_p0 = scmp.ne.s32.totalorder %s789_s19, %s785_s18  ;;  %p878_p1 = scmp.eq.s32.totalorder %s517_s24, 0 }
   0x9   : > { %p180_p2 = scmp.eq.s32.totalorder %s518_s25, 1  ;;  %p519_p4 = scmp.ge.s32.totalorder %s805_s23, 1 }
   0xa   : > { %p884_p3 = por %p878_p1, %p54_p0  ;;  %p187_p6 = scmp.lt.s32.totalorder %s805_s23, 3 }
   0xb   : > { %p889_p5 = por %p180_p2, %p54_p0  ;;  %s199_s6 = sshll.u32 %s1003_s1, 4  ;;  %s200_s6 = int_to_ptr.hbm [resolvable:$true] %s199_s6 }
   0xc   : > { %p897_p7 = pnand %p519_p4, %p187_p6  ;;  %p523_p8 = scmp.ge.s32.totalorder %s805_s23, 2 }
   0xd   : > { %s807_s8 = smov [#allocation6]   ;;  %s215_s12 = sshll.u32 %s1005_s3, 4  ;;  %s216_s12 = int_to_ptr.hbm [resolvable:$true] %s215_s12 }
   0xe   : > { %p548_p9 = pneg %p897_p7  ;;  %s201_s9 = sshll.u32 %s807_s8, 4  ;;  %s202_s9 = int_to_ptr.vmem [resolvable:$true] %s201_s9 }
   0xf   : > { %s808_s13 = smov [#allocation8]   ;;  %s809_s15 = smov 128  }
  0x10   : > { %p549_p10 = pnand %p548_p9, %p878_p1  ;;  %s217_s14 = sshll.u32 %s808_s13, 4  ;;  %s218_s14 = int_to_ptr.vmem [resolvable:$true] %s217_s14 }
  0x11   : > { %s810_s16 = smov 8   ;;  %p174_p11 = scmp.eq.s32.totalorder %s517_s24, 1 }
  0x12   : > { %551 = dma.hbm_to_vmem [thread:$0]  (!%p549_p10), %s200_s6, 16, %s202_s9, [#allocation7]  }
  0x13   : > { %554 = dma.hbm_to_vmem [thread:$0]  (!%p549_p10), %s216_s12, 512, %s218_s14, [#allocation7], %s809_s15, %s809_s15, %s810_s16  }
  0x14   : > { %s34_s17 = sadd.s32 1, %s801_s22  ;;  %s41_s25 = sadd.s32 1, %s793_s20 }
  0x15   : > { %p36_p12 = scmp.ge.s32.totalorder %s34_s17, 2  ;;  %p48_p13 = scmp.ne.s32.totalorder %s793_s20, %s789_s19 }
  0x16   : > { %p49_p0 = scmp.eq.s32.totalorder %s805_s23, 0  ;;  %p565_p4 = scmp.lt.s32.totalorder %s805_s23, 2 }
  0x17   : > { %s1019_s17 = smov (%p36_p12, %s34_s17), 0  ;;  %p918_p2 = por %p174_p11, %p48_p13 }
  0x18   : > { %s38_s30 = ssub.s32 %s801_s22, %s1019_s17  ;;  %s237_s6 = sand.u32 1, %s793_s20  }
  0x19   : > { %p39_p6 = scmp.eq.s32.totalorder %s38_s30, 0  ;;  %p50_p9 = por %p49_p0, %p48_p13 }
  0x1a   : > { %s524_s8 = sshll.u32 %s237_s6, 3  ;;  %s525_s24 = sshll.u32 %s801_s22, 3 }
  0x1b   : > { %s928_s9 = scalar_select %p39_p6, %s793_s20, %s41_s25  }
  0x1c   : > { %s245_s12 = scalar_lea.hbm %s1002_s0, %s525_s24  ;;  %s241_s14 = scalar_lea.vmem [#allocation3], %s524_s8 }
  0x1d   : > { %s247_s13 = sshll.u32 %s245_s12, 4  ;;  %s249_s15 = sshll.u32 %s241_s14, 4  ;;  %s248_s13 = int_to_ptr.hbm [resolvable:$true] %s247_s13  ;;  %s250_s15 = int_to_ptr.vmem [resolvable:$true] %s249_s15 }
  0x1e   : > { %p556_p10 = pnand %p565_p4, %p50_p9  ;;  %s238_s16 = scalar_lea.sflag [#allocation4], %s237_s6 }
  0x1f   : > { %258 = sbr.rel (%p897_p7) target bundleno = 447 (0x1bf), region = 40  ;;  %s938_s25 = sand.u32 (!%p897_p7), 1, %s789_s19  }
  0x20   : > { %558 = dma.hbm_to_vmem [thread:$0]  (!%p556_p10), %s248_s13, 128, %s250_s15, %s238_s16  }
  0x21   : > { %s527_s30 = sshll.u32 (!%p897_p7), %s938_s25, 3  ;;  %s261_s24 = scalar_lea.sflag (!%p897_p7), [#allocation4], %s938_s25 }
  0x22   : > { %s264_s8 = scalar_lea.vmem (!%p897_p7), [#allocation3], %s527_s30 }
  0x24   : > { %772 = dma.done.wait (%p884_p3), %s261_s24, 128  }
  0x25   : > { %774 = vsyncadd (%p884_p3), %s261_s24, 4294967168 }
  0x26   : > { %776 = dma.done.wait (%p878_p1), [#allocation7], 528  }
  0x27   : > { %778 = vsyncadd (%p878_p1), [#allocation7], 4294966768  ;;  %vm313_vm0 = vcmask 261120   ;;  %v312_v0 = vld [vmem:[%s264_s8] sm:$0xff]  ;;  %v811_v2 = vmov 32.0   ;;  %v355_v19 = vld [vmem:[#allocation8] sm:$0xff] }
  0x28   : > { %v314_v1 = vsel %vm313_vm0, %v312_v0, 0.0  ;;  %625 = vrcp.f32 %v811_v2  ;;  %v358_v14 = vld [vmem:[#allocation8 + $0x18] sm:$0xff]  ;;  %v357_v15 = vld [vmem:[#allocation8 + $0x10] sm:$0xff]  ;;  %v356_v16 = vld [vmem:[#allocation8 + $0x8] sm:$0xff]  ;;  %s533_s7 = sshll.u32 %s797_s21, 3  ;;  %s304_s14 = scalar_lea.vmem [#allocation9], %s527_s30 }
  0x29   : > { %315 = vadd.xlane.f32.xlu0 %v314_v1  ;;  %379 = vmatpush.msra.mxu0 %v358_v14  ;;  %v622_v27 = vld [vmem:[#allocation6] ss:$0 sm:$0xff]  ;;  %v623_v29 = vld [vmem:[%s1004_s2] ss:$0 sm:$0xff]  ;;  %s400_s11 = scalar_lea.hbm %s1007_s5, %s533_s7  ;;  %s402_s15 = sshll.u32 %s304_s14, 4  ;;  %s403_s15 = int_to_ptr.vmem [resolvable:$true] %s402_s15 }
  0x2a   : > { %v624_v34 = vld [vmem:[%s1006_s4] ss:$0 sm:$0xff]  ;;  %s404_s16 = sshll.u32 %s400_s11, 4  ;;  %s389_s24 = scalar_lea.sflag [#allocation5], %s938_s25  ;;  %s405_s16 = int_to_ptr.hbm [resolvable:$true] %s404_s16 }
  0x2b   : > { %380 = vmatpush.msra.mxu0 %v357_v15  ;;  %s733_s21 = sshra.s32 %s405_s16, 4  ;;  %s739_s7 = scalar_lea.hbm %s1007_s5, 16  ;;  %s734_s21 = int_to_ptr.hbm [resolvable:$true] %s733_s21 }
  0x2c   : > { %s735_s8 = scalar_lea.hbm %s734_s21, 8  ;;  %p740_p11 = scmp.lt.s32.totalorder %s734_s21, %s1007_s5 }
  0x2d   : > { %381 = vmatpush.msra.mxu0 %v356_v16  ;;  %p736_p1 = scmp.ne.s32.totalorder %s734_s21, %s735_s8  ;;  %p741_p12 = scmp.lt.s32.totalorder %s739_s7, %s735_s8 }
  0x2e   : > { %v626_v3 = vpop.eup %625 }
  0x2f   : > { %v318_v4 = vmul.f32 32.0, %v626_v3  ;;  %vm322_vm1 = vweird.f32 %v626_v3  ;;  %382 = vmatpush.msra.mxu0 %v355_v19  ;;  %p737_p3 = pnand %p736_p1, %p918_p2  ;;  %p742_p13 = por %p741_p12, %p740_p11 }
  0x31   : > { %v319_v5 = vsub.f32 1.0, %v318_v4  ;;  %p738_p7 = pneg %p737_p3 }
  0x33   : > { %v320_v6 = vmul.f32 %v626_v3, %v319_v5  ;;  %p743_p0 = pnand %p742_p13, %p738_p7 }
  0x35   : > { %v321_v7 = vadd.f32 %v626_v3, %v320_v6 }
  0x37   : > { %v323_v8 = vsel %vm322_vm1, %v626_v3, %v321_v7 }
  0x9c   : > { %v316_v9 = vpop.xlane.xlu0 %315 }
  0x9d   : > { %v324_v10 = vmul.f32 %v323_v8, %v316_v9 }
  0x9f   : > { %v325_v11 = vsub.f32 %v312_v0, %v324_v10 }
  0xa1   : > { %v326_v12 = vmul.f32 %v325_v11, %v325_v11 }
  0xa3   : > { %v327_v13 = vsel %vm313_vm0, %v326_v12, 0.0 }
  0xa4   : > { %328 = vadd.xlane.f32.xlu0 %v327_v13 }
 0x117   : > { %v329_v17 = vpop.xlane.xlu0 %328 }
 0x118   : > { %v330_v18 = vmul.f32 %v329_v17, %v323_v8 }
 0x11a   : > { %v331_v20 = vadd.f32 1e-05, %v330_v18 }
 0x11c   : > { %627 = vrsqrt.f32 %v331_v20  ;;  %vm338_vm3 = vweird.f32 %v331_v20 }
 0x122   : > { %v628_v21 = vpop.eup %627 }
 0x123   : > { %v333_v22 = vmul.f32 %v628_v21, %v331_v20  ;;  %vm339_vm2 = vweird.f32 %v628_v21 }
 0x124   : > { %vm340_vm4 = vmor %vm338_vm3, %vm339_vm2 }
 0x125   : > { %v334_v23 = vmul.f32 %v628_v21, %v333_v22 }
 0x127   : > { %v335_v24 = vmul.f32 0.5, %v334_v23 }
 0x129   : > { %v336_v25 = vsub.f32 1.5, %v335_v24 }
 0x12b   : > { %v337_v26 = vmul.f32 %v628_v21, %v336_v25 }
 0x12d   : > { %v341_v28 = vsel %vm340_vm4, %v628_v21, %v337_v26 }
 0x12e   : > { %v342_v30 = vmul.f32 %v341_v28, %v325_v11 }
 0x130   : > { %v347_v31 = vmul.f32 %v622_v27, %v342_v30 }
 0x132   : > { %v352_v32 = vadd.f32 %v623_v29, %v347_v31 }
 0x134   : > { %353 = vst.msk [vmem:[#allocation2] sm:$0xff] %vm313_vm0, %v352_v32 }
 0x13b   : > { %v354_v33 = vld [vmem:[#allocation2] sm:$0xff] }
 0x13c   : > { %531 = vmatmul.msk.f32.vlgmr.msra.gmra.mxu0 %vm313_vm0, %v354_v33 }
 0x1b9   : > { %v384_v35 = vpop.f32.mrf.mxu0 }
 0x1ba   : > { %v385_v36 = vadd.f32 %v624_v34, %v384_v35 }
 0x1bc   : > { %387 = vst [vmem:[%s304_s14] sm:$0xff] %v385_v36 }
 0x1bd   : > { %746 = shalt.err (!%p743_p0)
}
 0x1be   : > { %546 = dma.vmem_to_hbm [thread:$0]  (%p918_p2), %s403_s15, 128, %s405_s16, %s389_s24  }
 0x1bf PF: > { %s416_s25 = sand.u32 1, %s785_s18   ;;  %p560_p4 = pnand %p523_p8, %p889_p5 }
 0x1c0   : > { %s417_s10 = scalar_lea.sflag [#allocation5], %s416_s25 }
 0x1c1   : > { %p561_p6 = pneg %p560_p4 }
 0x1c3   : > { %780 = dma.done.wait (%p561_p6), %s417_s10, 128  }
 0x1c4   : > { %782 = vsyncadd (%p561_p6), %s417_s10, 4294967168  ;;  %s22_s23 = sadd.s32 1, %s805_s23   ;;  %s1013_s18 = smov %s789_s19 }
 0x1c5   : > { %p19_p9 = scmp.ge.s32.totalorder %s22_s23, 4   ;;  %s1014_s19 = smov %s793_s20 }
 0x1c6   : > { %s1015_s20 = smov %s928_s9  ;;  %s1016_s21 = smov %s801_s22 }
 0x1c7   : > { %s1017_s22 = smov %s1019_s17  ;;  %21 = sbr.rel (!%p19_p9) target bundleno = 7 (0x7), region = 101 }
 0x1cc   :  { %423 = vsyncpa [#allocation4], 1 }
 0x1cd   :  { %425 = vsyncpa [#allocation4 + $0x1], 1 }
 0x1ce   :  { %426 = vsyncpa [#allocation7], 1 }
 0x1cf   :  { %427 = vsyncpa [#allocation5], 1 }
 0x1d0   :  { %429 = vsyncpa [#allocation5 + $0x1], 1 }

</bundles_post_ra>
